<compile_context>
chip_gen: v6e
topology: v6e:2x2x1
jax: 0.10.0
libtpu: 0.0.40
codegen_flags: <defaults>
</compile_context>

<pallas_src>
import functools

import jax
import jax.numpy as jnp
from jax.experimental import pallas as pl
from jax.experimental.pallas import tpu as pltpu


def _round_up(a, m):
    return ((a + m - 1) // m) * m


def _mlp_kernel(n_hidden, x_ref, *refs):
    """Fused MLP forward over one batch tile.

    refs layout (after x_ref):
      refs[2*l], refs[2*l+1]   : w_ref bf16 [prev, h], b_ref f32 [1, h]  (BN+bias folded)
      refs[2*n_hidden]         : w_out_ref bf16 [8, h_last]  (row 0 = final weights, rows 1..7 zero)
      refs[2*n_hidden + 1]     : b_out_ref f32 [1]           (final Linear bias, SMEM)
      refs[-1]                 : out_ref  f32 [1, 1, TB]     (lane-dense result row)
    """
    out_ref = refs[-1]
    w_out_ref = refs[2 * n_hidden]
    b_out_ref = refs[2 * n_hidden + 1]

    # In-kernel bf16 cast of the streamed x tile (free VPU work under the DMA/MXU).
    h = x_ref[...].astype(jnp.bfloat16)                    # bf16 [TB, d_in]
    for l in range(n_hidden):
        w_ref = refs[2 * l]                                # bf16 [prev, h]
        b_ref = refs[2 * l + 1]                            # f32  [1, h]
        y = jnp.dot(h, w_ref[...], preferred_element_type=jnp.float32)
        a = jnp.maximum(y + b_ref[...], 0.0)               # f32 epilogue (Dropout eval == identity)
        h = a.astype(jnp.bfloat16)

    # Final Linear(prev, 1): w_row @ h^T on the MXU -> lane-dense (8, TB); keep row 0.
    r = jax.lax.dot_general(
        w_out_ref[...], h,
        dimension_numbers=(((1,), (1,)), ((), ())),        # contract h_last of both
        preferred_element_type=jnp.float32,
    )                                                      # f32 [8, TB]
    out_ref[...] = (r[0:1, :] + b_out_ref[0]).reshape(out_ref.shape)


def work_hours_net_forward(x, layer_params, out_w, out_b, *, tile_b=4096):
    """x: [B, d_in] f32.  layer_params: list of (w bf16 [prev,h], b f32 [1,h]).
    out_w: bf16 [8, h_last] (row 0 real, rest zero).  out_b: f32 [1].
    Returns f32 [B] (== squeeze(1))."""
    B, d_in = x.shape
    n_hidden = len(layer_params)

    # Tile selection: multiple of 8 (sublane), capped so there are >=2 tiles whenever B is
    # big enough -> both v7x TensorCores get work via the "parallel" batch axis.
    cap = _round_up(max(pl.cdiv(B, 2), 8), 128)
    tb = max(8, min(tile_b, cap, _round_up(B, 8)))
    tb = _round_up(tb, 8)
    num_tiles = pl.cdiv(B, tb)

    flat_inputs = [x]
    in_specs = [pl.BlockSpec((tb, d_in), lambda i: (i, 0))]
    for (w, b) in layer_params:
        flat_inputs += [w, b]
        in_specs += [
            pl.BlockSpec(w.shape, lambda i: (0, 0)),   # constant index_map -> VMEM-resident
            pl.BlockSpec(b.shape, lambda i: (0, 0)),
        ]
    flat_inputs += [out_w, out_b]
    in_specs += [
        pl.BlockSpec(out_w.shape, lambda i: (0, 0)),
        pl.BlockSpec(memory_space=pltpu.MemorySpace.SMEM),   # scalar bias via SMEM
    ]

    # Advisory cost estimate (mem/overhead-bound kernel).
    h_sizes = [w.shape[1] for (w, _) in layer_params]
    flops = 2 * B * (sum(a * b for a, b in zip([d_in] + h_sizes[:-1], h_sizes)) + h_sizes[-1])
    bytes_accessed = (
        x.size * x.dtype.itemsize + B * 4
        + sum(w.size * w.dtype.itemsize + b.size * b.dtype.itemsize for (w, b) in layer_params)
        + out_w.size * out_w.dtype.itemsize + out_b.size * out_b.dtype.itemsize
    )

    out = pl.pallas_call(
        functools.partial(_mlp_kernel, n_hidden),
        out_shape=jax.ShapeDtypeStruct((num_tiles, 1, tb), jnp.float32),
        grid=(num_tiles,),
        in_specs=in_specs,
        out_specs=pl.BlockSpec((1, 1, tb), lambda i: (i, 0, 0)),
        compiler_params=pltpu.CompilerParams(
            dimension_semantics=("parallel",),
        ),
        cost_estimate=pl.CostEstimate(
            flops=flops, transcendentals=0, bytes_accessed=bytes_accessed),
    )(*flat_inputs)

    # Row-major flatten: tile i occupies [i*tb, (i+1)*tb); drop ragged-tail garbage rows.
    return out.reshape(-1)[:B]


def init_params(key, d_in, hidden):
    """Torch-default-style init; BatchNorm1d (eval, non-trivial running stats) and the
    Linear bias are folded host-side into (W' bf16, b' f32) per hidden layer."""
    eps = 1e-5
    layers = []
    prev = d_in
    for h in hidden:
        key, kw, kb, km, kv = jax.random.split(key, 5)
        bound = 1.0 / jnp.sqrt(prev)
        w = jax.random.uniform(kw, (prev, h), jnp.float32, -bound, bound)
        b = jax.random.uniform(kb, (h,), jnp.float32, -bound, bound)
        # BatchNorm1d eval-mode parameters / running stats.
        gamma = jnp.ones((h,), jnp.float32)
        beta = jnp.zeros((h,), jnp.float32)
        running_mean = 0.1 * jax.random.normal(km, (h,), jnp.float32)
        running_var = jnp.abs(1.0 + 0.1 * jax.random.normal(kv, (h,), jnp.float32))
        scale = gamma / jnp.sqrt(running_var + eps)
        shift = beta - running_mean * scale
        w_folded = (w * scale[None, :]).astype(jnp.bfloat16)   # W' = W * scale
        b_folded = (b * scale + shift)[None, :]                # b' = b*scale + shift (f32)
        layers.append((w_folded, b_folded))
        prev = h

    key, kw, kb = jax.random.split(key, 3)
    bound = 1.0 / jnp.sqrt(prev)
    w_row = jax.random.uniform(kw, (1, prev), jnp.float32, -bound, bound)
    b_out = jax.random.uniform(kb, (1,), jnp.float32, -bound, bound)
    # Pad the final weight row to 8 sublanes (zeros) so the closing w_row @ h^T matmul
    # has an MXU-friendly M dim; only row 0 of the result is kept.
    w_out = jnp.zeros((8, prev), jnp.float32).at[0].set(w_row[0]).astype(jnp.bfloat16)
    return layers, w_out, b_out


def reference_forward(x, layer_params, out_w, out_b):
    """Pure-JAX reference with identical bf16/f32 rounding as the kernel."""
    h = x.astype(jnp.bfloat16)
    for (w, b) in layer_params:
        y = jnp.dot(h, w, preferred_element_type=jnp.float32) + b
        h = jnp.maximum(y, 0.0).astype(jnp.bfloat16)
    r = jax.lax.dot_general(out_w, h, (((1,), (1,)), ((), ())),
                            preferred_element_type=jnp.float32)   # (8, B)
    return r[0] + out_b[0]


if __name__ == "__main__":
    key = jax.random.PRNGKey(0)
    d_in, hidden = 16, (32, 64)

    key, kp = jax.random.split(key)
    layer_params, out_w, out_b = init_params(kp, d_in, hidden)

    # Single-tile, multi-tile-with-ragged-tail, and multi-tile exact sizes.
    for B in (8, 200, 2000):
        key, kx = jax.random.split(key)
        x = jax.random.normal(kx, (B, d_in), jnp.float32)

        y = work_hours_net_forward(x, layer_params, out_w, out_b, tile_b=4096)
        y = jax.block_until_ready(y)

        y_ref = reference_forward(x, layer_params, out_w, out_b)
        assert y.shape == (B,), y.shape
        assert jnp.allclose(y, y_ref, atol=1e-3, rtol=1e-3), (
            B, float(jnp.max(jnp.abs(y - y_ref))))

    print("KERNEL_OK")
</pallas_src>

<mosaic_0001>
module attributes {stable_mosaic.version = 11 : i64} {
  func.func @_mlp_kernel(%arg0: i32, %arg1: memref<8x16xf32, #tpu.memory_space<vmem>>, %arg2: memref<16x32xbf16, #tpu.memory_space<vmem>>, %arg3: memref<1x32xf32, #tpu.memory_space<vmem>>, %arg4: memref<32x64xbf16, #tpu.memory_space<vmem>>, %arg5: memref<1x64xf32, #tpu.memory_space<vmem>>, %arg6: memref<8x64xbf16, #tpu.memory_space<vmem>>, %arg7: memref<1xf32, #tpu.memory_space<smem>>, %arg8: memref<1x1x8xf32, #tpu.memory_space<vmem>>) attributes {dimension_semantics = [#tpu.dimension_semantics<parallel>], iteration_bounds = array<i64: 1>, scalar_prefetch = 0 : i64, scratch_operands = 0 : i64, tpu.core_type = #tpu.core_type<tc>, window_params = [{transform_indices = @transform_0, window_bounds = array<i64: 8, 16>}, {pipeline_mode = #tpu.pipeline_mode<synchronous>, transform_indices = @transform_1, window_bounds = array<i64: 16, 32>}, {pipeline_mode = #tpu.pipeline_mode<synchronous>, transform_indices = @transform_2, window_bounds = array<i64: 1, 32>}, {pipeline_mode = #tpu.pipeline_mode<synchronous>, transform_indices = @transform_3, window_bounds = array<i64: 32, 64>}, {pipeline_mode = #tpu.pipeline_mode<synchronous>, transform_indices = @transform_4, window_bounds = array<i64: 1, 64>}, {pipeline_mode = #tpu.pipeline_mode<synchronous>, transform_indices = @transform_5, window_bounds = array<i64: 8, 64>}, {transform_indices = @transform_6, window_bounds = array<i64: 1>}, {transform_indices = @transform_7, window_bounds = array<i64: 1, 1, 8>}]} {
    %c0 = arith.constant 0 : index
    %c0_0 = arith.constant 0 : index
    %0 = vector.load %arg1[%c0, %c0_0] : memref<8x16xf32, #tpu.memory_space<vmem>>, vector<8x16xf32>
    %1 = arith.truncf %0 : vector<8x16xf32> to vector<8x16xbf16>
    %c0_1 = arith.constant 0 : index
    %c0_2 = arith.constant 0 : index
    %2 = vector.load %arg2[%c0_1, %c0_2] : memref<16x32xbf16, #tpu.memory_space<vmem>>, vector<16x32xbf16>
    %cst = arith.constant dense<0.000000e+00> : vector<8x32xf32>
    %3 = tpu.matmul %1, %2, %cst {dimension_numbers = #tpu.dot_dimension_numbers<[1], [0], [0], [1], [0, 0, 1, 1], [], []>} : vector<8x16xbf16>, vector<16x32xbf16>, vector<8x32xf32> -> vector<8x32xf32>
    %c0_3 = arith.constant 0 : index
    %c0_4 = arith.constant 0 : index
    %4 = vector.load %arg3[%c0_3, %c0_4] : memref<1x32xf32, #tpu.memory_space<vmem>>, vector<1x32xf32>
    %5 = vector.broadcast %4 : vector<1x32xf32> to vector<8x32xf32>
    %6 = arith.addf %3, %5 : vector<8x32xf32>
    %cst_5 = arith.constant 0.000000e+00 : f32
    %7 = vector.broadcast %cst_5 : f32 to vector<8x32xf32>
    %8 = arith.maximumf %6, %7 : vector<8x32xf32>
    %9 = arith.truncf %8 : vector<8x32xf32> to vector<8x32xbf16>
    %c0_6 = arith.constant 0 : index
    %c0_7 = arith.constant 0 : index
    %10 = vector.load %arg4[%c0_6, %c0_7] : memref<32x64xbf16, #tpu.memory_space<vmem>>, vector<32x64xbf16>
    %cst_8 = arith.constant dense<0.000000e+00> : vector<8x64xf32>
    %11 = tpu.matmul %9, %10, %cst_8 {dimension_numbers = #tpu.dot_dimension_numbers<[1], [0], [0], [1], [0, 0, 1, 1], [], []>} : vector<8x32xbf16>, vector<32x64xbf16>, vector<8x64xf32> -> vector<8x64xf32>
    %c0_9 = arith.constant 0 : index
    %c0_10 = arith.constant 0 : index
    %12 = vector.load %arg5[%c0_9, %c0_10] : memref<1x64xf32, #tpu.memory_space<vmem>>, vector<1x64xf32>
    %13 = vector.broadcast %12 : vector<1x64xf32> to vector<8x64xf32>
    %14 = arith.addf %11, %13 : vector<8x64xf32>
    %cst_11 = arith.constant 0.000000e+00 : f32
    %15 = vector.broadcast %cst_11 : f32 to vector<8x64xf32>
    %16 = arith.maximumf %14, %15 : vector<8x64xf32>
    %17 = arith.truncf %16 : vector<8x64xf32> to vector<8x64xbf16>
    %c0_12 = arith.constant 0 : index
    %c0_13 = arith.constant 0 : index
    %18 = vector.load %arg6[%c0_12, %c0_13] : memref<8x64xbf16, #tpu.memory_space<vmem>>, vector<8x64xbf16>
    %cst_14 = arith.constant dense<0.000000e+00> : vector<8x8xf32>
    %19 = tpu.matmul %18, %17, %cst_14 {dimension_numbers = #tpu.dot_dimension_numbers<[1], [1], [0], [0], [0, 0, 1, 0], [], []>} : vector<8x64xbf16>, vector<8x64xbf16>, vector<8x8xf32> -> vector<8x8xf32>
    %20 = vector.extract_strided_slice %19 {offsets = [0, 0], sizes = [1, 8], strides = [1, 1]} : vector<8x8xf32> to vector<1x8xf32>
    %c0_15 = arith.constant 0 : index
    %21 = memref.load %arg7[%c0_15] : memref<1xf32, #tpu.memory_space<smem>>
    %22 = vector.broadcast %21 : f32 to vector<1x8xf32>
    %23 = arith.addf %20, %22 : vector<1x8xf32>
    %24 = vector.shape_cast %23 : vector<1x8xf32> to vector<1x1x8xf32>
    %c0_16 = arith.constant 0 : index
    %c0_17 = arith.constant 0 : index
    %c0_18 = arith.constant 0 : index
    %25 = vector.load %arg8[%c0_16, %c0_17, %c0_18] : memref<1x1x8xf32, #tpu.memory_space<vmem>>, vector<1x1x8xf32>
    tpu.vector_store %arg8[%c0_16, %c0_17, %c0_18], %24 {strides = array<i32>} : memref<1x1x8xf32, #tpu.memory_space<vmem>>, vector<1x1x8xf32>,
    return
  }
  func.func @transform_0(%arg0: i32) -> (i32, i32) {
    %c0_i32 = arith.constant 0 : i32
    %c0_i32_0 = arith.constant 0 : i32
    return %arg0, %c0_i32 : i32, i32
  }
  func.func @transform_1(%arg0: i32) -> (i32, i32) {
    %c0_i32 = arith.constant 0 : i32
    %c0_i32_0 = arith.constant 0 : i32
    %c0_i32_1 = arith.constant 0 : i32
    return %c0_i32, %c0_i32_0 : i32, i32
  }
  func.func @transform_2(%arg0: i32) -> (i32, i32) {
    %c0_i32 = arith.constant 0 : i32
    %c0_i32_0 = arith.constant 0 : i32
    %c0_i32_1 = arith.constant 0 : i32
    return %c0_i32, %c0_i32_0 : i32, i32
  }
  func.func @transform_3(%arg0: i32) -> (i32, i32) {
    %c0_i32 = arith.constant 0 : i32
    %c0_i32_0 = arith.constant 0 : i32
    %c0_i32_1 = arith.constant 0 : i32
    return %c0_i32, %c0_i32_0 : i32, i32
  }
  func.func @transform_4(%arg0: i32) -> (i32, i32) {
    %c0_i32 = arith.constant 0 : i32
    %c0_i32_0 = arith.constant 0 : i32
    %c0_i32_1 = arith.constant 0 : i32
    return %c0_i32, %c0_i32_0 : i32, i32
  }
  func.func @transform_5(%arg0: i32) -> (i32, i32) {
    %c0_i32 = arith.constant 0 : i32
    %c0_i32_0 = arith.constant 0 : i32
    %c0_i32_1 = arith.constant 0 : i32
    return %c0_i32, %c0_i32_0 : i32, i32
  }
  func.func @transform_6(%arg0: i32) -> i32 {
    %c0_i32 = arith.constant 0 : i32
    %c0_i32_0 = arith.constant 0 : i32
    return %c0_i32 : i32
  }
  func.func @transform_7(%arg0: i32) -> (i32, i32, i32) {
    %c0_i32 = arith.constant 0 : i32
    %c0_i32_0 = arith.constant 0 : i32
    %c0_i32_1 = arith.constant 0 : i32
    return %arg0, %c0_i32, %c0_i32_0 : i32, i32, i32
  }
}

</mosaic_0001>

<bundles_post_ra>
// kernel: tpu_custom_call.1
= control target key start
LH: loop header
LB: loop body
LE: loop exit
PB: predicated region body
PF: predicated region fallthrough
CT: control target
= control target key end

     0   :  { %13 = vsyncpa [#allocation4], 0  ;;  %s473_s0 = inlined_call_operand.hbm [shape: f32[8,16], index: 0, kind: input, shape index: {}]   ;;  %s474_s1 = inlined_call_operand.hbm [shape: bf16[16,32], index: 1, kind: input, shape index: {}]   ;;  %s475_s2 = inlined_call_operand.vmem [shape: f32[1,32], index: 2, kind: input, shape index: {}]   ;;  %s476_s3 = inlined_call_operand.hbm [shape: bf16[32,64], index: 3, kind: input, shape index: {}]   ;;  %s477_s4 = inlined_call_operand.vmem [shape: f32[1,64], index: 4, kind: input, shape index: {}]   ;;  %s478_s5 = inlined_call_operand.vmem [shape: bf16[8,64], index: 5, kind: input, shape index: {}]   ;;  %s479_s6 = inlined_call_operand.<no memory space> [shape: f32[1], index: 6, kind: input, shape index: {}]   ;;  %s480_s7 = inlined_call_operand.hbm [shape: f32[1,1,8], index: 7, kind: output, shape index: {}]  }
   0x1   :  { %14 = vsyncpa [#allocation7], 0 }
   0x2   :  { %15 = vsyncpa [#allocation5], 0  ;;  %s401_s24 = smov [#allocation6]  }
   0x3   :  { %s31_s25 = sshll.u32 %s401_s24, 4  ;;  %s32_s25 = int_to_ptr.vmem [resolvable:$true] %s31_s25 }
   0x4   :  { %s323_s26 = scalar_lea.vmem %s32_s25, 128  ;;  %p328_p1 = scmp.lt.s32.totalorder %s32_s25, %s32_s25 }
   0x5   :  { %p324_p0 = scmp.ne.s32.totalorder %s32_s25, %s323_s26  ;;  %p329_p2 = scmp.lt.s32.totalorder %s323_s26, %s323_s26 }
   0x7   :  { %p330_p3 = por %p329_p2, %p328_p1 }
   0x9   :  { %p331_p4 = pnand %p330_p3, %p324_p0 }
   0xb   :  { %334 = shalt.err (!%p331_p4)
}
   0xc   :  { %s402_s27 = smov 64   ;;  %s403_s28 = smov 4  }
   0xd   :  { %37 = dma.hbm_to_vmem [thread:$0]  %s474_s1, 128, %s32_s25, [#allocation7], %s402_s27, %s402_s27, %s403_s28  }
   0xe   :  { %s404_s8 = smov [#allocation3]   ;;  %s405_s10 = smov [#allocation8]  }
   0xf   :  { %s22_s9 = sshll.u32 %s404_s8, 4  ;;  %s45_s11 = sshll.u32 %s405_s10, 4  ;;  %s23_s9 = int_to_ptr.vmem [resolvable:$true] %s22_s9  ;;  %s46_s11 = int_to_ptr.vmem [resolvable:$true] %s45_s11 }
  0x10   :  { %s343_s12 = scalar_lea.vmem %s23_s9, 128  ;;  %p348_p6 = scmp.lt.s32.totalorder %s23_s9, %s23_s9 }
  0x11   :  { %p344_p5 = scmp.ne.s32.totalorder %s23_s9, %s343_s12  ;;  %p349_p7 = scmp.lt.s32.totalorder %s343_s12, %s343_s12 }
  0x13   :  { %p350_p8 = por %p349_p7, %p348_p6 }
  0x15   :  { %p351_p9 = pnand %p350_p8, %p344_p5 }
  0x17   :  { %354 = shalt.err (!%p351_p9)
}
  0x18   :  { %25 = dma.hbm_to_vmem [thread:$0]  %s473_s0, 128, %s23_s9, [#allocation4]  }
  0x19   :  { %s363_s15 = scalar_lea.vmem %s46_s11, 256  ;;  %p368_p11 = scmp.lt.s32.totalorder %s46_s11, %s46_s11 }
  0x1a   :  { %p364_p10 = scmp.ne.s32.totalorder %s46_s11, %s363_s15  ;;  %p369_p12 = scmp.lt.s32.totalorder %s363_s15, %s363_s15 }
  0x1c   :  { %p370_p13 = por %p369_p12, %p368_p11 }
  0x1e   :  { %p371_p0 = pnand %p370_p13, %p364_p10 }
  0x20   :  { %374 = shalt.err (!%p371_p0)
}
  0x21   :  { %51 = dma.hbm_to_vmem [thread:$0]  %s476_s3, 256, %s46_s11, [#allocation7], %s402_s27, %s402_s27, %s403_s28  }
  0x22   :  { %395 = dma.done.wait [#allocation4], 128  }
  0x23   :  { %396 = vsyncadd [#allocation4], 4294967168 }
  0x24   :  { %397 = dma.done.wait [#allocation7], 384  }
  0x25   :  { %398 = vsyncadd [#allocation7], 4294966912  ;;  %v406_v0 = vmov 0.0   ;;  %vm407_vm0 = vmmov 0   ;;  %v312_v1 = vld [vmem:[#allocation6] sm:$0xff]   ;;  %v68_v2 = vld [vmem:[#allocation3] sm:$0xff]  ;;  %v249_v24 = vstv %s479_s6 }
  0x26   :  { %284 = vmatprep.subr.bf16.mxu0 %v406_v0  ;;  %286 = vmatprep.mubr.msk.bf16.mxu0 %vm407_vm0, %v406_v0  ;;  %vm85_vm1 = vcmask 130048   ;;  %v69_v3 = vpack.c.bf16 %v68_v2, %v68_v2  ;;  %v313_v4 = vld [vmem:[#allocation8 + $0x8] sm:$0xff]   ;;  %v314_v5 = vld [vmem:[#allocation8] sm:$0xff]   ;;  %v269_v6 = vld [vmem:[%s475_s2] ss:$0 sm:$0xff]  ;;  %vm154_vm2 = vcmask 261120  }
  0x27   :  { %290 = vmatprep.subr.bf16.mxu1 %v406_v0  ;;  %294 = vmatprep.mubr.msk.bf16.mxu1 %vm407_vm0, %v406_v0  ;;  %v272_v14 = vld [vmem:[%s477_s4] ss:$0 sm:$0xff]  ;;  %vm201_vm3 = vcmask 523264   ;;  %s408_s4 = smov [#allocation9]   ;;  %vm251_vm4 = vcmask 57344  }
  0x28   :  { %285 = vmatpush3.bf16.msra.mxu0 %v312_v1  ;;  %291 = vmatpush3.bf16.msra.mxu1 %v313_v4  ;;  %v200_v23 = vld [vmem:[%s478_s5] sm:$0xf]  ;;  %s259_s22 = sshll.u32 %s408_s4, 4  ;;  %s260_s22 = int_to_ptr.vmem [resolvable:$true] %s259_s22 }
  0x29   :  { %298 = vmatprep.subr.bf16.mxu0 %v406_v0  ;;  %292 = vmatprep.subr.bf16.mxu1 %v406_v0  ;;  %s375_s23 = scalar_lea.vmem %s260_s22, 16  ;;  %s379_s24 = scalar_lea.vmem %s260_s22, 32 }
  0x2a   :  { %p376_p1 = scmp.ne.s32.totalorder %s260_s22, %s375_s23  ;;  %p380_p2 = scmp.lt.s32.totalorder %s260_s22, %s260_s22 }
  0x2b   :  { %287 = vmatmul.mubr.msk.bf16.vlgmr.msra.gmra.mxu0 %vm85_vm1, %v69_v3  ;;  %p381_p3 = scmp.lt.s32.totalorder %s379_s24, %s375_s23 }
  0x2c   :  { %300 = vmatprep.mubr.msk.bf16.mxu0 %vm407_vm0, %v406_v0  ;;  %293 = vmatpush3.bf16.msra.mxu1 %v314_v5 }
  0x2d   :  { %p382_p4 = por %p381_p3, %p380_p2 }
  0x2f   :  { %p383_p5 = pnand %p382_p4, %p376_p1 }
  0xeb   :  { %v123_v7 = vpop.f32.mrf.mxu0 }
  0xec   :  { %v124_v8 = vadd.f32 %v269_v6, %v123_v7 }
  0xed   :  { %v288_v9 = vpop.f32.mrf.mxu0 }
  0xee   :  { %v129_v10 = vmax.f32 %v124_v8, 0.0 }
  0xef   :  { %v126_v11 = vpop.f32.mrf.mxu0 }
  0xf0   :  { %v130_v12 = vpack.c.bf16 %v129_v10, %v129_v10 }
  0xf1   :  { %v289_v13 = vpop.f32.mrf.mxu0 }
  0xf2   :  { %295 = vmatmul.mubr.msk.bf16.vlgmr.msra.gmra.mxu1 %vm154_vm2, %v130_v12 }
 0x1b2   :  { %v192_v15 = vpop.f32.mrf.mxu1 }
 0x1b3   :  { %v193_v16 = vadd.f32 %v272_v14, %v192_v15 }
 0x1b4   :  { %v296_v17 = vpop.f32.mrf.mxu1 }
 0x1b5   :  { %v198_v18 = vmax.f32 %v193_v16, 0.0 }
 0x1b6   :  { %v195_v19 = vpop.f32.mrf.mxu1 }
 0x1b7   :  { %v199_v20 = vpack.c.bf16 %v198_v18, %v198_v18 }
 0x1b8   :  { %v297_v21 = vpop.f32.mrf.mxu1 }
 0x1b9   :  { %v206_v22 = vsel %vm201_vm3, %v199_v20, 0 }
 0x1ba   :  { %299 = vmatpush3.bf16.xpose.msra.mxu0 %v206_v22 }
 0x1c1   :  { %301 = vmatmul.mubr.msk.bf16.vlgmr.msra.gmra.mxu0 %vm201_vm3, %v200_v23 }
 0x281   :  { %v242_v25 = vpop.f32.mrf.mxu0 }
 0x282   :  { %v250_v26 = vadd.f32 %v249_v24, %v242_v25 }
 0x283   :  { %v302_v27 = vpop.f32.mrf.mxu0 }
 0x284   :  { %252 = vst.msk [vmem:[#allocation9] sm:$0x1] %vm251_vm4, %v250_v26 }
 0x285   :  { %v245_v28 = vpop.f32.mrf.mxu0 }
 0x286   :  { %386 = shalt.err (!%p383_p5)
}
 0x287   :  { %262 = dma.vmem_to_hbm [thread:$0]  %s260_s22, 16, %s480_s7, [#allocation5]   ;;  %v303_v29 = vpop.f32.mrf.mxu0 }
 0x288   :  { %399 = dma.done.wait [#allocation5], 16  }
 0x289   :  { %400 = vsyncadd [#allocation5], 4294967280 }
 0x28a   :  { %266 = vsyncpa [#allocation4], 1 }
 0x28b   :  { %267 = vsyncpa [#allocation7], 1 }
 0x28c   :  { %268 = vsyncpa [#allocation5], 1 }

</bundles_post_ra>
